<compile_context>
chip_gen: v6e
topology: v6e:2x2x1
jax: 0.10.0
libtpu: 0.0.40
codegen_flags: <defaults>
</compile_context>

<pallas_src>
import jax
import jax.numpy as jnp
from jax.experimental import pallas as pl
from jax.experimental.pallas import tpu as pltpu

_LANE = 128


def _round_up(n, m):
    return ((n + m - 1) // m) * m


def _leaky_relu(x, slope=0.2):
    return jnp.where(x > 0, x, slope * x)


def discriminator_kernel(x_ref, w1T_ref, b1_ref, w2T_ref, b2_ref, w3_ref, b3_ref,
                         o_ref):
    """One batch tile of the 3-layer MLP; batch on the lane axis throughout."""
    mxu_dtype = w1T_ref.dtype                  # bf16 fast path or f32 exact path
    x = x_ref[...]                             # [T, Dp], streamed as f32
    if x.dtype != mxu_dtype:
        x = x.astype(mxu_dtype)                # quantize only at the MXU

    # Layer 1: contract the shared feature dim of W1^T [H1p, Dp] and x [T, Dp]
    # -> h1 [H1p, T] (batch on lanes).  f32 accumulation on the MXU.
    h1 = jax.lax.dot_general(
        w1T_ref[...], x,
        dimension_numbers=(((1,), (1,)), ((), ())),
        preferred_element_type=jnp.float32)
    h1 = _leaky_relu(h1 + b1_ref[...])         # (H1p,1) bias lane-broadcast, f32 VPU

    # Layer 2: [H2p, H1p] @ [H1p, T] -> [H2p, T].
    h2 = jnp.dot(w2T_ref[...], h1.astype(mxu_dtype),
                 preferred_element_type=jnp.float32)
    h2 = _leaky_relu(h2 + b2_ref[...])

    # Layer 3 has out_features == 1: VPU multiply + sublane (XLU) reduction
    # instead of a 1-wide MXU pass.  [1, T] result is lane-dense for the store.
    logit = jnp.sum(h2 * w3_ref[...], axis=0, keepdims=True) + b3_ref[0]
    o_ref[...] = jax.nn.sigmoid(logit).astype(o_ref.dtype)


def _choose_batch_tiling(B, max_batch_tile):
    """Balanced, lane-aligned batch tiles; >=2 tiles when batch allows (v7x)."""
    n_groups = _round_up(B, _LANE) // _LANE                 # 128-wide lane groups
    max_groups = max(1, _round_up(max(_LANE, max_batch_tile), _LANE) // _LANE)
    min_tiles = 2 if n_groups >= 2 else 1                   # feed both v7x TCs
    num_tiles = min(n_groups, max(min_tiles, -(-n_groups // max_groups)))
    tile = _LANE * (-(-n_groups // num_tiles))              # balanced -> minimal last-tile pad
    num_tiles = -(-n_groups // (tile // _LANE))
    return tile, num_tiles


def discriminator_forward(x, params, *, max_batch_tile=2048, use_bf16=True):
    """x: [B, D] float32.  params: W1,b1,W2,b2,W3,b3 stored as [in,out] / [1,out]."""
    B, D = x.shape
    H1 = params["W1"].shape[1]
    H2 = params["W2"].shape[1]

    w_dtype = jnp.bfloat16 if use_bf16 else jnp.float32
    w_size = 2 if use_bf16 else 4
    granule = 16 if use_bf16 else 8        # sublane packing granule of the MXU dtype

    # Feature/hidden dims: pad only to the sublane granule (zero padding is
    # numerically exact through LeakyReLU and the zeroed w3 rows).
    Dp = _round_up(D, granule)
    H1p = _round_up(H1, granule)
    H2p = _round_up(H2, granule)

    def vmem_bytes(tile):
        x_b = 2 * tile * Dp * 4                                        # 2x-buffered f32 x tile
        w_b = (H1p * Dp + H2p * H1p) * w_size + (H1p + 2 * H2p) * 4    # resident, 1 buffer
        o_b = 2 * tile * 4                                             # 2x-buffered (1, tile) out
        act = (H1p + H2p) * tile * 4                                   # h1 / h2 f32 temporaries
        return x_b + w_b + o_b + act

    # Largest balanced tile that fits a conservative VMEM budget (v7x has only
    # 64 MiB physical VMEM; leave room for compiler-internal scratch).
    budget = 40 << 20
    batch_tile, num_tiles = _choose_batch_tiling(B, max_batch_tile)
    while vmem_bytes(batch_tile) > budget and batch_tile > _LANE:
        batch_tile, num_tiles = _choose_batch_tiling(B, max(_LANE, batch_tile // 2))
    Bp = num_tiles * batch_tile
    vmem_limit = int(min(48 << 20, max(16 << 20, 2 * vmem_bytes(batch_tile))))

    # x goes in untransposed and uncast; pad only when the tiling demands it.
    x_in = x.astype(jnp.float32)
    if Bp != B or Dp != D:
        x_in = jnp.pad(x_in, ((0, Bp - B), (0, Dp - D)))

    def pad2(a, rows, cols, dtype):
        r, c = a.shape
        if r != rows or c != cols:
            a = jnp.pad(a, ((0, rows - r), (0, cols - c)))
        return a.astype(dtype)

    # Resident (loaded-once) operands, transposed so batch stays on lanes.
    W1T = pad2(params["W1"].T, H1p, Dp, w_dtype)               # [H1p, Dp]
    b1 = pad2(params["b1"].T, H1p, 1, jnp.float32)             # [H1p, 1]
    W2T = pad2(params["W2"].T, H2p, H1p, w_dtype)              # [H2p, H1p]
    b2 = pad2(params["b2"].T, H2p, 1, jnp.float32)             # [H2p, 1]
    w3 = pad2(params["W3"], H2p, 1, jnp.float32)               # [H2p, 1] column
    b3 = params["b3"].reshape(-1).astype(jnp.float32)          # (1,) scalar -> SMEM

    def build(weight_pipeline_mode):
        kw = {} if weight_pipeline_mode is None else dict(
            pipeline_mode=weight_pipeline_mode)

        def const_spec(shape):
            return pl.BlockSpec(shape, lambda i: (0, 0), **kw)

        return pl.pallas_call(
            discriminator_kernel,
            out_shape=jax.ShapeDtypeStruct((1, Bp), jnp.float32),
            grid_spec=pltpu.PrefetchScalarGridSpec(
                num_scalar_prefetch=0,
                grid=(num_tiles,),
                in_specs=[
                    pl.BlockSpec((batch_tile, Dp), lambda i: (i, 0)),   # x (pipelined)
                    const_spec((H1p, Dp)),        # W1^T (resident)
                    const_spec((H1p, 1)),         # b1
                    const_spec((H2p, H1p)),       # W2^T
                    const_spec((H2p, 1)),         # b2
                    const_spec((H2p, 1)),         # W3 column
                    pl.BlockSpec(memory_space=pltpu.MemorySpace.SMEM),  # b3 scalar
                ],
                out_specs=pl.BlockSpec((1, batch_tile), lambda i: (0, i)),  # lane-dense
            ),
            compiler_params=pltpu.CompilerParams(
                dimension_semantics=("parallel",),   # batch tiles -> both v7x TCs
                vmem_limit_bytes=vmem_limit),
        )

    args = (x_in, W1T, b1, W2T, b2, w3, b3)
    single_buf = pl.Buffered(1) if hasattr(pl, "Buffered") else None
    try:
        out = build(single_buf)(*args)    # resident weights single-buffered (v7x VMEM)
    except Exception:
        if single_buf is None:
            raise
        out = build(None)(*args)          # fallback: default double-buffered weights

    return out.reshape(-1)[:B].reshape(B, 1)


def init_params(key, input_dim):
    """Deterministic init matching nn.Linear shapes; stored as [in, out]."""
    h1 = 2 * input_dim // 3
    h2 = input_dim // 3
    keys = jax.random.split(key, 6)

    def lin(kw, kb, fan_in, fan_out):
        bound = 1.0 / jnp.sqrt(fan_in)
        W = jax.random.uniform(kw, (fan_in, fan_out), jnp.float32, -bound, bound)
        b = jax.random.uniform(kb, (1, fan_out), jnp.float32, -bound, bound)
        return W, b

    W1, b1 = lin(keys[0], keys[1], input_dim, h1)
    W2, b2 = lin(keys[2], keys[3], h1, h2)
    W3, b3 = lin(keys[4], keys[5], h2, 1)
    return {"W1": W1, "b1": b1, "W2": W2, "b2": b2, "W3": W3, "b3": b3}


def reference_forward(x, p):
    hp = jax.lax.Precision.HIGHEST
    h1 = _leaky_relu(jnp.dot(x, p["W1"], precision=hp) + p["b1"])
    h2 = _leaky_relu(jnp.dot(h1, p["W2"], precision=hp) + p["b2"])
    return jax.nn.sigmoid(jnp.dot(h2, p["W3"], precision=hp) + p["b3"])


if __name__ == "__main__":
    key = jax.random.PRNGKey(0)
    kx, kp = jax.random.split(key)

    B, D = 16, 48  # input_dim=48 -> hidden sizes 32 and 16, output 1
    x = jax.random.normal(kx, (B, D), jnp.float32)
    params = init_params(kp, D)

    y_ref = reference_forward(x, params)

    # Exact f32 verification path.
    y_f32 = jax.block_until_ready(discriminator_forward(x, params, use_bf16=False))
    assert y_f32.shape == (B, 1)
    assert jnp.allclose(y_f32, y_ref, atol=1e-5, rtol=1e-5), \
        float(jnp.max(jnp.abs(y_f32 - y_ref)))

    # bf16-MXU production path (f32 accumulation / f32 activations; x is
    # quantized only inside the kernel, HBM stream stays f32).
    y_bf16 = jax.block_until_ready(discriminator_forward(x, params, use_bf16=True))
    assert y_bf16.shape == (B, 1)
    assert jnp.allclose(y_bf16, y_ref, atol=2e-2), \
        float(jnp.max(jnp.abs(y_bf16 - y_ref)))

    print("KERNEL_OK")
</pallas_src>

<mosaic_0001>
module attributes {stable_mosaic.version = 11 : i64} {
  func.func @discriminator_kernel(%arg0: i32, %arg1: memref<128x48xf32, #tpu.memory_space<vmem>>, %arg2: memref<32x48xf32, #tpu.memory_space<vmem>>, %arg3: memref<32x1xf32, #tpu.memory_space<vmem>>, %arg4: memref<16x32xf32, #tpu.memory_space<vmem>>, %arg5: memref<16x1xf32, #tpu.memory_space<vmem>>, %arg6: memref<16x1xf32, #tpu.memory_space<vmem>>, %arg7: memref<1xf32, #tpu.memory_space<smem>>, %arg8: memref<1x128xf32, #tpu.memory_space<vmem>>) attributes {dimension_semantics = [#tpu.dimension_semantics<parallel>], iteration_bounds = array<i64: 1>, scalar_prefetch = 0 : i64, scratch_operands = 0 : i64, tpu.core_type = #tpu.core_type<tc>, window_params = [{transform_indices = @transform_0, window_bounds = array<i64: 128, 48>}, {pipeline_mode = #tpu.pipeline_mode<synchronous>, transform_indices = @transform_1, window_bounds = array<i64: 32, 48>}, {pipeline_mode = #tpu.pipeline_mode<synchronous>, transform_indices = @transform_2, window_bounds = array<i64: 32, 1>}, {pipeline_mode = #tpu.pipeline_mode<synchronous>, transform_indices = @transform_3, window_bounds = array<i64: 16, 32>}, {pipeline_mode = #tpu.pipeline_mode<synchronous>, transform_indices = @transform_4, window_bounds = array<i64: 16, 1>}, {pipeline_mode = #tpu.pipeline_mode<synchronous>, transform_indices = @transform_5, window_bounds = array<i64: 16, 1>}, {transform_indices = @transform_6, window_bounds = array<i64: 1>}, {transform_indices = @transform_7, window_bounds = array<i64: 1, 128>}]} {
    %c0 = arith.constant 0 : index
    %c0_0 = arith.constant 0 : index
    %0 = vector.load %arg1[%c0, %c0_0] : memref<128x48xf32, #tpu.memory_space<vmem>>, vector<128x48xf32>
    %c0_1 = arith.constant 0 : index
    %c0_2 = arith.constant 0 : index
    %1 = vector.load %arg2[%c0_1, %c0_2] : memref<32x48xf32, #tpu.memory_space<vmem>>, vector<32x48xf32>
    %cst = arith.constant dense<0.000000e+00> : vector<32x128xf32>
    %2 = tpu.matmul %1, %0, %cst {dimension_numbers = #tpu.dot_dimension_numbers<[1], [1], [0], [0], [0, 0, 1, 0], [], []>} : vector<32x48xf32>, vector<128x48xf32>, vector<32x128xf32> -> vector<32x128xf32>
    %c0_3 = arith.constant 0 : index
    %c0_4 = arith.constant 0 : index
    %3 = vector.load %arg3[%c0_3, %c0_4] : memref<32x1xf32, #tpu.memory_space<vmem>>, vector<32x1xf32>
    %4 = vector.broadcast %3 : vector<32x1xf32> to vector<32x128xf32>
    %5 = arith.addf %2, %4 : vector<32x128xf32>
    %cst_5 = arith.constant 0.000000e+00 : f32
    %6 = vector.broadcast %cst_5 : f32 to vector<32x128xf32>
    %7 = arith.cmpf ogt, %5, %6 : vector<32x128xf32>
    %cst_6 = arith.constant 2.000000e-01 : f32
    %8 = vector.broadcast %cst_6 : f32 to vector<32x128xf32>
    %9 = arith.mulf %8, %5 : vector<32x128xf32>
    %10 = arith.select %7, %5, %9 : vector<32x128xi1>, vector<32x128xf32>
    %c0_7 = arith.constant 0 : index
    %c0_8 = arith.constant 0 : index
    %11 = vector.load %arg4[%c0_7, %c0_8] : memref<16x32xf32, #tpu.memory_space<vmem>>, vector<16x32xf32>
    %cst_9 = arith.constant dense<0.000000e+00> : vector<16x128xf32>
    %12 = tpu.matmul %11, %10, %cst_9 {dimension_numbers = #tpu.dot_dimension_numbers<[1], [0], [0], [1], [0, 0, 1, 1], [], []>} : vector<16x32xf32>, vector<32x128xf32>, vector<16x128xf32> -> vector<16x128xf32>
    %c0_10 = arith.constant 0 : index
    %c0_11 = arith.constant 0 : index
    %13 = vector.load %arg5[%c0_10, %c0_11] : memref<16x1xf32, #tpu.memory_space<vmem>>, vector<16x1xf32>
    %14 = vector.broadcast %13 : vector<16x1xf32> to vector<16x128xf32>
    %15 = arith.addf %12, %14 : vector<16x128xf32>
    %cst_12 = arith.constant 0.000000e+00 : f32
    %16 = vector.broadcast %cst_12 : f32 to vector<16x128xf32>
    %17 = arith.cmpf ogt, %15, %16 : vector<16x128xf32>
    %cst_13 = arith.constant 2.000000e-01 : f32
    %18 = vector.broadcast %cst_13 : f32 to vector<16x128xf32>
    %19 = arith.mulf %18, %15 : vector<16x128xf32>
    %20 = arith.select %17, %15, %19 : vector<16x128xi1>, vector<16x128xf32>
    %c0_14 = arith.constant 0 : index
    %c0_15 = arith.constant 0 : index
    %21 = vector.load %arg6[%c0_14, %c0_15] : memref<16x1xf32, #tpu.memory_space<vmem>>, vector<16x1xf32>
    %22 = vector.broadcast %21 : vector<16x1xf32> to vector<16x128xf32>
    %23 = arith.mulf %20, %22 : vector<16x128xf32>
    %cst_16 = arith.constant dense<0.000000e+00> : vector<128xf32>
    %24 = vector.multi_reduction <add>, %23, %cst_16 [0] : vector<16x128xf32> to vector<128xf32>
    %25 = vector.shape_cast %24 : vector<128xf32> to vector<1x128xf32>
    %c0_17 = arith.constant 0 : index
    %26 = memref.load %arg7[%c0_17] : memref<1xf32, #tpu.memory_space<smem>>
    %27 = vector.broadcast %26 : f32 to vector<1x128xf32>
    %28 = arith.addf %25, %27 : vector<1x128xf32>
    %29 = arith.negf %28 : vector<1x128xf32>
    %30 = math.exp %29 : vector<1x128xf32>
    %cst_18 = arith.constant 1.000000e+00 : f32
    %31 = vector.broadcast %cst_18 : f32 to vector<1x128xf32>
    %32 = arith.addf %31, %30 : vector<1x128xf32>
    %33 = arith.divf %31, %32 : vector<1x128xf32>
    %c0_19 = arith.constant 0 : index
    %c0_20 = arith.constant 0 : index
    %34 = vector.load %arg8[%c0_19, %c0_20] : memref<1x128xf32, #tpu.memory_space<vmem>>, vector<1x128xf32>
    tpu.vector_store %arg8[%c0_19, %c0_20], %33 {strides = array<i32>} : memref<1x128xf32, #tpu.memory_space<vmem>>, vector<1x128xf32>,
    return
  }
  func.func @transform_0(%arg0: i32) -> (i32, i32) {
    %c0_i32 = arith.constant 0 : i32
    %c0_i32_0 = arith.constant 0 : i32
    return %arg0, %c0_i32 : i32, i32
  }
  func.func @transform_1(%arg0: i32) -> (i32, i32) {
    %c0_i32 = arith.constant 0 : i32
    %c0_i32_0 = arith.constant 0 : i32
    %c0_i32_1 = arith.constant 0 : i32
    return %c0_i32, %c0_i32_0 : i32, i32
  }
  func.func @transform_2(%arg0: i32) -> (i32, i32) {
    %c0_i32 = arith.constant 0 : i32
    %c0_i32_0 = arith.constant 0 : i32
    %c0_i32_1 = arith.constant 0 : i32
    return %c0_i32, %c0_i32_0 : i32, i32
  }
  func.func @transform_3(%arg0: i32) -> (i32, i32) {
    %c0_i32 = arith.constant 0 : i32
    %c0_i32_0 = arith.constant 0 : i32
    %c0_i32_1 = arith.constant 0 : i32
    return %c0_i32, %c0_i32_0 : i32, i32
  }
  func.func @transform_4(%arg0: i32) -> (i32, i32) {
    %c0_i32 = arith.constant 0 : i32
    %c0_i32_0 = arith.constant 0 : i32
    %c0_i32_1 = arith.constant 0 : i32
    return %c0_i32, %c0_i32_0 : i32, i32
  }
  func.func @transform_5(%arg0: i32) -> (i32, i32) {
    %c0_i32 = arith.constant 0 : i32
    %c0_i32_0 = arith.constant 0 : i32
    %c0_i32_1 = arith.constant 0 : i32
    return %c0_i32, %c0_i32_0 : i32, i32
  }
  func.func @transform_6(%arg0: i32) -> i32 {
    %c0_i32 = arith.constant 0 : i32
    %c0_i32_0 = arith.constant 0 : i32
    return %c0_i32 : i32
  }
  func.func @transform_7(%arg0: i32) -> (i32, i32) {
    %c0_i32 = arith.constant 0 : i32
    %c0_i32_0 = arith.constant 0 : i32
    return %c0_i32, %arg0 : i32, i32
  }
}

module attributes {stable_mosaic.version = 11 : i64} {
  func.func @discriminator_kernel(%arg0: i32, %arg1: memref<128x48xf32, #tpu.memory_space<vmem>>, %arg2: memref<32x48xf32, #tpu.memory_space<vmem>>, %arg3: memref<32x1xf32, #tpu.memory_space<vmem>>, %arg4: memref<16x32xf32, #tpu.memory_space<vmem>>, %arg5: memref<16x1xf32, #tpu.memory_space<vmem>>, %arg6: memref<16x1xf32, #tpu.memory_space<vmem>>, %arg7: memref<1xf32, #tpu.memory_space<smem>>, %arg8: memref<1x128xf32, #tpu.memory_space<vmem>>) attributes {dimension_semantics = [#tpu.dimension_semantics<parallel>], iteration_bounds = array<i64: 1>, scalar_prefetch = 0 : i64, scratch_operands = 0 : i64, tpu.core_type = #tpu.core_type<tc>, window_params = [{transform_indices = @transform_0, window_bounds = array<i64: 128, 48>}, {pipeline_mode = #tpu.pipeline_mode<synchronous>, transform_indices = @transform_1, window_bounds = array<i64: 32, 48>}, {pipeline_mode = #tpu.pipeline_mode<synchronous>, transform_indices = @transform_2, window_bounds = array<i64: 32, 1>}, {pipeline_mode = #tpu.pipeline_mode<synchronous>, transform_indices = @transform_3, window_bounds = array<i64: 16, 32>}, {pipeline_mode = #tpu.pipeline_mode<synchronous>, transform_indices = @transform_4, window_bounds = array<i64: 16, 1>}, {pipeline_mode = #tpu.pipeline_mode<synchronous>, transform_indices = @transform_5, window_bounds = array<i64: 16, 1>}, {transform_indices = @transform_6, window_bounds = array<i64: 1>}, {transform_indices = @transform_7, window_bounds = array<i64: 1, 128>}]} {
    %c0 = arith.constant 0 : index
    %c0_0 = arith.constant 0 : index
    %0 = vector.load %arg1[%c0, %c0_0] : memref<128x48xf32, #tpu.memory_space<vmem>>, vector<128x48xf32>
    %c0_1 = arith.constant 0 : index
    %c0_2 = arith.constant 0 : index
    %1 = vector.load %arg2[%c0_1, %c0_2] : memref<32x48xf32, #tpu.memory_space<vmem>>, vector<32x48xf32>
    %cst = arith.constant dense<0.000000e+00> : vector<32x128xf32>
    %2 = tpu.matmul %1, %0, %cst {dimension_numbers = #tpu.dot_dimension_numbers<[1], [1], [0], [0], [0, 0, 1, 0], [], []>} : vector<32x48xf32>, vector<128x48xf32>, vector<32x128xf32> -> vector<32x128xf32>
    %c0_3 = arith.constant 0 : index
    %c0_4 = arith.constant 0 : index
    %3 = vector.load %arg3[%c0_3, %c0_4] : memref<32x1xf32, #tpu.memory_space<vmem>>, vector<32x1xf32>
    %4 = vector.broadcast %3 : vector<32x1xf32> to vector<32x128xf32>
    %5 = arith.addf %2, %4 : vector<32x128xf32>
    %cst_5 = arith.constant 0.000000e+00 : f32
    %6 = vector.broadcast %cst_5 : f32 to vector<32x128xf32>
    %7 = arith.cmpf ogt, %5, %6 : vector<32x128xf32>
    %cst_6 = arith.constant 2.000000e-01 : f32
    %8 = vector.broadcast %cst_6 : f32 to vector<32x128xf32>
    %9 = arith.mulf %8, %5 : vector<32x128xf32>
    %10 = arith.select %7, %5, %9 : vector<32x128xi1>, vector<32x128xf32>
    %c0_7 = arith.constant 0 : index
    %c0_8 = arith.constant 0 : index
    %11 = vector.load %arg4[%c0_7, %c0_8] : memref<16x32xf32, #tpu.memory_space<vmem>>, vector<16x32xf32>
    %cst_9 = arith.constant dense<0.000000e+00> : vector<16x128xf32>
    %12 = tpu.matmul %11, %10, %cst_9 {dimension_numbers = #tpu.dot_dimension_numbers<[1], [0], [0], [1], [0, 0, 1, 1], [], []>} : vector<16x32xf32>, vector<32x128xf32>, vector<16x128xf32> -> vector<16x128xf32>
    %c0_10 = arith.constant 0 : index
    %c0_11 = arith.constant 0 : index
    %13 = vector.load %arg5[%c0_10, %c0_11] : memref<16x1xf32, #tpu.memory_space<vmem>>, vector<16x1xf32>
    %14 = vector.broadcast %13 : vector<16x1xf32> to vector<16x128xf32>
    %15 = arith.addf %12, %14 : vector<16x128xf32>
    %cst_12 = arith.constant 0.000000e+00 : f32
    %16 = vector.broadcast %cst_12 : f32 to vector<16x128xf32>
    %17 = arith.cmpf ogt, %15, %16 : vector<16x128xf32>
    %cst_13 = arith.constant 2.000000e-01 : f32
    %18 = vector.broadcast %cst_13 : f32 to vector<16x128xf32>
    %19 = arith.mulf %18, %15 : vector<16x128xf32>
    %20 = arith.select %17, %15, %19 : vector<16x128xi1>, vector<16x128xf32>
    %c0_14 = arith.constant 0 : index
    %c0_15 = arith.constant 0 : index
    %21 = vector.load %arg6[%c0_14, %c0_15] : memref<16x1xf32, #tpu.memory_space<vmem>>, vector<16x1xf32>
    %22 = vector.broadcast %21 : vector<16x1xf32> to vector<16x128xf32>
    %23 = arith.mulf %20, %22 : vector<16x128xf32>
    %cst_16 = arith.constant dense<0.000000e+00> : vector<128xf32>
    %24 = vector.multi_reduction <add>, %23, %cst_16 [0] : vector<16x128xf32> to vector<128xf32>
    %25 = vector.shape_cast %24 : vector<128xf32> to vector<1x128xf32>
    %c0_17 = arith.constant 0 : index
    %26 = memref.load %arg7[%c0_17] : memref<1xf32, #tpu.memory_space<smem>>
    %27 = vector.broadcast %26 : f32 to vector<1x128xf32>
    %28 = arith.addf %25, %27 : vector<1x128xf32>
    %29 = arith.negf %28 : vector<1x128xf32>
    %30 = math.exp %29 : vector<1x128xf32>
    %cst_18 = arith.constant 1.000000e+00 : f32
    %31 = vector.broadcast %cst_18 : f32 to vector<1x128xf32>
    %32 = arith.addf %31, %30 : vector<1x128xf32>
    %33 = arith.divf %31, %32 : vector<1x128xf32>
    %c0_19 = arith.constant 0 : index
    %c0_20 = arith.constant 0 : index
    %34 = vector.load %arg8[%c0_19, %c0_20] : memref<1x128xf32, #tpu.memory_space<vmem>>, vector<1x128xf32>
    tpu.vector_store %arg8[%c0_19, %c0_20], %33 {strides = array<i32>} : memref<1x128xf32, #tpu.memory_space<vmem>>, vector<1x128xf32>,
    return
  }
  func.func @transform_0(%arg0: i32) -> (i32, i32) {
    %c0_i32 = arith.constant 0 : i32
    %c0_i32_0 = arith.constant 0 : i32
    return %arg0, %c0_i32 : i32, i32
  }
  func.func @transform_1(%arg0: i32) -> (i32, i32) {
    %c0_i32 = arith.constant 0 : i32
    %c0_i32_0 = arith.constant 0 : i32
    %c0_i32_1 = arith.constant 0 : i32
    return %c0_i32, %c0_i32_0 : i32, i32
  }
  func.func @transform_2(%arg0: i32) -> (i32, i32) {
    %c0_i32 = arith.constant 0 : i32
    %c0_i32_0 = arith.constant 0 : i32
    %c0_i32_1 = arith.constant 0 : i32
    return %c0_i32, %c0_i32_0 : i32, i32
  }
  func.func @transform_3(%arg0: i32) -> (i32, i32) {
    %c0_i32 = arith.constant 0 : i32
    %c0_i32_0 = arith.constant 0 : i32
    %c0_i32_1 = arith.constant 0 : i32
    return %c0_i32, %c0_i32_0 : i32, i32
  }
  func.func @transform_4(%arg0: i32) -> (i32, i32) {
    %c0_i32 = arith.constant 0 : i32
    %c0_i32_0 = arith.constant 0 : i32
    %c0_i32_1 = arith.constant 0 : i32
    return %c0_i32, %c0_i32_0 : i32, i32
  }
  func.func @transform_5(%arg0: i32) -> (i32, i32) {
    %c0_i32 = arith.constant 0 : i32
    %c0_i32_0 = arith.constant 0 : i32
    %c0_i32_1 = arith.constant 0 : i32
    return %c0_i32, %c0_i32_0 : i32, i32
  }
  func.func @transform_6(%arg0: i32) -> i32 {
    %c0_i32 = arith.constant 0 : i32
    %c0_i32_0 = arith.constant 0 : i32
    return %c0_i32 : i32
  }
  func.func @transform_7(%arg0: i32) -> (i32, i32) {
    %c0_i32 = arith.constant 0 : i32
    %c0_i32_0 = arith.constant 0 : i32
    return %c0_i32, %arg0 : i32, i32
  }
}

</mosaic_0001>

<bundles_post_ra>
// kernel: tpu_custom_call.1
= control target key start
LH: loop header
LB: loop body
LE: loop exit
PB: predicated region body
PF: predicated region fallthrough
CT: control target
= control target key end

     0   :  { %vm72_vm0 = vcmask 392192   ;;  %v505_v2 = vmov 0   ;;  %s681_s0 = inlined_call_operand.vmem [shape: f32[128,48], index: 0, kind: input, shape index: {}]   ;;  %s682_s1 = inlined_call_operand.vmem [shape: f32[32,48], index: 1, kind: input, shape index: {}]   ;;  %s683_s2 = inlined_call_operand.vmem [shape: f32[32,1], index: 2, kind: input, shape index: {}]   ;;  %s684_s3 = inlined_call_operand.vmem [shape: f32[16,32], index: 3, kind: input, shape index: {}]   ;;  %s685_s4 = inlined_call_operand.vmem [shape: f32[16,1], index: 4, kind: input, shape index: {}]   ;;  %s686_s5 = inlined_call_operand.vmem [shape: f32[16,1], index: 5, kind: input, shape index: {}]   ;;  %s687_s6 = inlined_call_operand.<no memory space> [shape: f32[1], index: 6, kind: input, shape index: {}]   ;;  %s688_s7 = inlined_call_operand.hbm [shape: f32[1,128], index: 7, kind: output, shape index: {}]  }
   0x1   :  { %v43_v0 = vld [vmem:[%s681_s0 + $0x78] sm:$0xff]  ;;  %v42_v1 = vld [vmem:[%s681_s0 + $0x70] sm:$0xff]  ;;  %477 = vset.pattern.permute.xlu0 %v505_v2  ;;  %478 = vset.pattern.permute.xlu1 %v505_v2  ;;  %v41_v3 = vld [vmem:[%s681_s0 + $0x68] sm:$0xff] }
   0x2   :  { %426 = vmatprep.subr.msk.mxu0 %vm72_vm0, %v43_v0  ;;  %v44_v4 = vld [vmem:[%s682_s1] sm:$0xff]  ;;  %v51_v5 = vld [vmem:[%s683_s2 + $0x18] sm:$0xff]  ;;  %v49_v6 = vld [vmem:[%s683_s2 + $0x8] sm:$0xff] }
   0x3   :  { %427 = vmatpush3.xpose.msk.msra.mxu0 %vm72_vm0, %v43_v0  ;;  %458 = vmatprep.mubr.msk.f32.mxu0 %vm72_vm0, %v44_v4  ;;  %v40_v7 = vld [vmem:[%s681_s0 + $0x60] sm:$0xff]  ;;  %v50_v8 = vld [vmem:[%s683_s2 + $0x10] sm:$0xff] }
   0x4   :  { %428 = vmatprep.subr.msk.mxu0 %vm72_vm0, %v42_v1  ;;  %69 = vperm.xlu0 %477, %v51_v5   ;;  %v48_v9 = vld [vmem:[%s683_s2] sm:$0xff] }
   0x5   :  { %59 = vperm.xlu1 %478, %v49_v6  }
   0x7   :  { %429 = vmatpush3.xpose.msk.msra.mxu0 %vm72_vm0, %v42_v1 }
   0x8   :  { %430 = vmatprep.subr.msk.mxu0 %vm72_vm0, %v41_v3 }
   0x9   :  { %13 = vsyncpa [#allocation4], 0  ;;  %64 = vperm.xlu0 %477, %v50_v8   ;;  %v39_v10 = vld [vmem:[%s681_s0 + $0x58] sm:$0xff]  ;;  %v232_v11 = vld [vmem:[%s685_s4] sm:$0xff]  ;;  %54 = vperm.xlu1 %478, %v48_v9   ;;  %vm244_vm1 = vcmask 261120   ;;  %s506_s9 = smov [#allocation3]  }
   0xa   :  { %v233_v12 = vld [vmem:[%s685_s4 + $0x8] sm:$0xff]  ;;  %v38_v13 = vld [vmem:[%s681_s0 + $0x50] sm:$0xff]  ;;  %v332_v14 = vld [vmem:[%s686_s5] sm:$0xff] }
   0xb   :  { %431 = vmatpush3.xpose.msk.msra.mxu0 %vm72_vm0, %v41_v3  ;;  %v333_v15 = vld [vmem:[%s686_s5 + $0x8] sm:$0xff]  ;;  %v36_v17 = vld [vmem:[%s681_s0 + $0x40] sm:$0xff]  ;;  %v35_v18 = vld [vmem:[%s681_s0 + $0x38] sm:$0xff]  ;;  %s369_s5 = sshll.u32 %s506_s9, 4  ;;  %s370_s5 = int_to_ptr.vmem [resolvable:$true] %s369_s5 }
   0xc   :  { %432 = vmatprep.subr.msk.mxu0 %vm72_vm0, %v40_v7  ;;  %v37_v16 = vld [vmem:[%s681_s0 + $0x48] sm:$0xff]  ;;  %v34_v19 = vld [vmem:[%s681_s0 + $0x30] sm:$0xff]  ;;  %v32_v21 = vld [vmem:[%s681_s0 + $0x20] sm:$0xff]  ;;  %s483_s10 = scalar_lea.vmem %s370_s5, 16  ;;  %s487_s11 = scalar_lea.vmem %s370_s5, 32 }
   0xd   :  { %236 = vperm.xlu0 %477, %v232_v11   ;;  %241 = vperm.xlu1 %478, %v233_v12   ;;  %v33_v20 = vld [vmem:[%s681_s0 + $0x28] sm:$0xff]  ;;  %v31_v22 = vld [vmem:[%s681_s0 + $0x18] sm:$0xff]  ;;  %v30_v23 = vld [vmem:[%s681_s0 + $0x10] sm:$0xff]  ;;  %p484_p0 = scmp.ne.s32.totalorder %s370_s5, %s483_s10  ;;  %p488_p1 = scmp.lt.s32.totalorder %s370_s5, %s370_s5 }
   0xe   :  { %v29_v24 = vld [vmem:[%s681_s0 + $0x8] sm:$0xff]  ;;  %v28_v25 = vld [vmem:[%s681_s0] sm:$0xff]  ;;  %v46_v27 = vld [vmem:[%s682_s1 + $0x10] sm:$0xff]  ;;  %p489_p2 = scmp.lt.s32.totalorder %s487_s11, %s483_s10 }
   0xf   :  { %433 = vmatpush3.xpose.msk.msra.mxu0 %vm72_vm0, %v40_v7  ;;  %v45_v26 = vld [vmem:[%s682_s1 + $0x8] sm:$0xff]  ;;  %v47_v28 = vld [vmem:[%s682_s1 + $0x18] sm:$0xff]  ;;  %v230_v29 = vld [vmem:[%s684_s3] sm:$0xff]  ;;  %v354_v7 = vstv %s687_s6 }
  0x10   :  { %434 = vmatprep.subr.msk.mxu0 %vm72_vm0, %v39_v10  ;;  %472 = vmatprep.mubr.msk.f32.mxu1 %vm244_vm1, %v230_v29  ;;  %v231_v50 = vld [vmem:[%s684_s3 + $0x8] sm:$0xff]  ;;  %p490_p3 = por %p489_p2, %p488_p1 }
  0x11   :  { %336 = vperm.xlu0 %477, %v332_v14   ;;  %341 = vperm.xlu1 %478, %v333_v15  }
  0x12   :  { %p491_p4 = pnand %p490_p3, %p484_p0 }
  0x13   :  { %435 = vmatpush3.xpose.msk.msra.mxu0 %vm72_vm0, %v39_v10 }
  0x14   :  { %436 = vmatprep.subr.msk.mxu0 %vm72_vm0, %v38_v13 }
  0x17   :  { %437 = vmatpush3.xpose.msk.msra.mxu0 %vm72_vm0, %v38_v13 }
  0x18   :  { %438 = vmatprep.subr.msk.mxu0 %vm72_vm0, %v37_v16 }
  0x1b   :  { %439 = vmatpush3.xpose.msk.msra.mxu0 %vm72_vm0, %v37_v16 }
  0x1c   :  { %440 = vmatprep.subr.msk.mxu0 %vm72_vm0, %v36_v17 }
  0x1f   :  { %441 = vmatpush3.xpose.msk.msra.mxu0 %vm72_vm0, %v36_v17 }
  0x20   :  { %442 = vmatprep.subr.msk.mxu0 %vm72_vm0, %v35_v18 }
  0x23   :  { %443 = vmatpush3.xpose.msk.msra.mxu0 %vm72_vm0, %v35_v18 }
  0x24   :  { %444 = vmatprep.subr.msk.mxu0 %vm72_vm0, %v34_v19 }
  0x27   :  { %445 = vmatpush3.xpose.msk.msra.mxu0 %vm72_vm0, %v34_v19 }
  0x28   :  { %446 = vmatprep.subr.msk.mxu0 %vm72_vm0, %v33_v20 }
  0x2b   :  { %447 = vmatpush3.xpose.msk.msra.mxu0 %vm72_vm0, %v33_v20 }
  0x2c   :  { %448 = vmatprep.subr.msk.mxu0 %vm72_vm0, %v32_v21 }
  0x2f   :  { %449 = vmatpush3.xpose.msk.msra.mxu0 %vm72_vm0, %v32_v21 }
  0x30   :  { %450 = vmatprep.subr.msk.mxu0 %vm72_vm0, %v31_v22 }
  0x33   :  { %451 = vmatpush3.xpose.msk.msra.mxu0 %vm72_vm0, %v31_v22 }
  0x34   :  { %452 = vmatprep.subr.msk.mxu0 %vm72_vm0, %v30_v23 }
  0x37   :  { %453 = vmatpush3.xpose.msk.msra.mxu0 %vm72_vm0, %v30_v23 }
  0x38   :  { %454 = vmatprep.subr.msk.mxu0 %vm72_vm0, %v29_v24 }
  0x3b   :  { %455 = vmatpush3.xpose.msk.msra.mxu0 %vm72_vm0, %v29_v24 }
  0x3c   :  { %456 = vmatprep.subr.msk.mxu0 %vm72_vm0, %v28_v25 }
  0x3f   :  { %457 = vmatpush3.xpose.msk.msra.mxu0 %vm72_vm0, %v28_v25 }
  0x42   :  { %459 = vmatmul.mubr.msk.f32.vlgmr.msra.gmra.mxu0 %vm72_vm0, %v45_v26 }
  0x43   :  { %461 = vmatprep.mubr.msk.f32.mxu0 %vm72_vm0, %v46_v27 }
  0x46   :  { %462 = vmatmul.mubr.msk.f32.gmra.mxu0 %vm72_vm0, %v47_v28 }
  0x7f   :  { %v70_v30 = vpop.permute.xlu0 %69 }
  0x80   :  { %v60_v31 = vpop.permute.xlu1 %59 }
  0x84   :  { %v65_v35 = vpop.permute.xlu0 %64  ;;  %v55_v38 = vpop.permute.xlu1 %54 }
  0x88   :  { %v242_v51 = vpop.permute.xlu1 %241  ;;  %v237_v53 = vpop.permute.xlu0 %236 }
  0x8c   :  { %v337_v60 = vpop.permute.xlu0 %336  ;;  %v342_v61 = vpop.permute.xlu1 %341 }
 0x102   :  { %v460_v32 = vpop.f32.mrf.mxu0 }
 0x103   :  { %v205_v36 = vadd.f32 %v460_v32, %v60_v31 }
 0x104   :  { %v199_v33 = vpop.f32.mrf.mxu0 }
 0x105   :  { %v200_v40 = vadd.f32 %v199_v33, %v55_v38  ;;  %v223_v43 = vmul.f32 0.2, %v205_v36  ;;  %vm219_vm4 = vcmp.gt.f32.partialorder %v205_v36, 0.0 }
 0x106   :  { %v463_v34 = vpop.f32.mrf.mxu0 }
 0x107   :  { %v215_v37 = vadd.f32 %v463_v34, %v70_v30  ;;  %v222_v46 = vmul.f32 0.2, %v200_v40  ;;  %vm218_vm5 = vcmp.gt.f32.partialorder %v200_v40, 0.0  ;;  %v227_v48 = vsel %vm219_vm4, %v205_v36, %v223_v43 }
 0x108   :  { %v209_v39 = vpop.f32.mrf.mxu0 }
 0x109   :  { %v210_v41 = vadd.f32 %v209_v39, %v65_v35  ;;  %vm221_vm2 = vcmp.gt.f32.partialorder %v215_v37, 0.0  ;;  %v225_v42 = vmul.f32 0.2, %v215_v37  ;;  %v226_v49 = vsel %vm218_vm5, %v200_v40, %v222_v46 }
 0x10b   :  { %v224_v44 = vmul.f32 0.2, %v210_v41  ;;  %v229_v45 = vsel %vm221_vm2, %v215_v37, %v225_v42  ;;  %vm220_vm3 = vcmp.gt.f32.partialorder %v210_v41, 0.0 }
 0x10c   :  { %464 = vmatprep.subr.mxu1 %v229_v45 }
 0x10d   :  { %465 = vmatpush3.msra.mxu1 %v229_v45  ;;  %v228_v47 = vsel %vm220_vm3, %v210_v41, %v224_v44 }
 0x10e   :  { %466 = vmatprep.subr.mxu1 %v228_v47 }
 0x10f   :  { %467 = vmatpush3.msra.mxu1 %v228_v47 }
 0x110   :  { %468 = vmatprep.subr.mxu1 %v227_v48 }
 0x111   :  { %469 = vmatpush3.msra.mxu1 %v227_v48 }
 0x112   :  { %470 = vmatprep.subr.mxu1 %v226_v49 }
 0x113   :  { %471 = vmatpush3.msra.mxu1 %v226_v49 }
 0x114   :  { %473 = vmatmul.mubr.msk.f32.vlgmr.msra.gmra.mxu1 %vm244_vm1, %v231_v50 }
 0x1d4   :  { %v474_v52 = vpop.f32.mrf.mxu1 }
 0x1d5   :  { %v323_v54 = vadd.f32 %v474_v52, %v242_v51 }
 0x1d6   :  { %v317_v55 = vpop.f32.mrf.mxu1 }
 0x1d7   :  { %vm327_vm6 = vcmp.gt.f32.partialorder %v323_v54, 0.0  ;;  %v329_v56 = vmul.f32 0.2, %v323_v54  ;;  %v318_v57 = vadd.f32 %v317_v55, %v237_v53 }
 0x1d9   :  { %v331_v58 = vsel %vm327_vm6, %v323_v54, %v329_v56  ;;  %vm326_vm7 = vcmp.gt.f32.partialorder %v318_v57, 0.0  ;;  %v328_v59 = vmul.f32 0.2, %v318_v57 }
 0x1da   :  { %v345_v63 = vmul.f32 %v342_v61, %v331_v58 }
 0x1db   :  { %v330_v62 = vsel %vm326_vm7, %v318_v57, %v328_v59 }
 0x1dc   :  { %v344_v0 = vmul.f32 %v337_v60, %v330_v62 }
 0x1de   :  { %v346_v1 = vadd.f32 %v345_v63, %v344_v0 }
 0x1e0   :  { %v347_v2 = vrot.slane %v346_v1, 4 }
 0x1e2   :  { %v348_v3 = vadd.f32 %v347_v2, %v346_v1 }
 0x1e4   :  { %v349_v4 = vrot.slane %v348_v3, 2 }
 0x1e6   :  { %v350_v5 = vadd.f32 %v349_v4, %v348_v3 }
 0x1e8   :  { %v351_v6 = vrot.slane %v350_v5, 1 }
 0x1ea   :  { %v352_v8 = vadd.f32 %v351_v6, %v350_v5 }
 0x1ec   :  { %v355_v9 = vadd.f32 %v354_v7, %v352_v8 }
 0x1ee   :  { %v399_v10 = vmul.f32 -1.442695, %v355_v9 }
 0x1f0   :  { %479 = vpow2.f32 %v399_v10 }
 0x1fd   :  { %v480_v11 = vpop.eup %479 }
 0x1fe   :  { %v359_v12 = vadd.f32 1.0, %v480_v11 }
 0x200   :  { %481 = vrcp.f32 %v359_v12 }
 0x20d   :  { %v482_v13 = vpop.eup %481 }
 0x20e   :  { %362 = vst [vmem:[#allocation3] sm:$0x1] %v482_v13 }
 0x20f   :  { %494 = shalt.err (!%p491_p4)
}
 0x210   :  { %372 = dma.vmem_to_hbm [thread:$0]  %s370_s5, 16, %s688_s7, [#allocation4]  }
 0x211   :  { %503 = dma.done.wait [#allocation4], 16  }
 0x212   :  { %504 = vsyncadd [#allocation4], 4294967280 }
 0x213   :  { %376 = vsyncpa [#allocation4], 1 }

// kernel: tpu_custom_call.1
= control target key start
LH: loop header
LB: loop body
LE: loop exit
PB: predicated region body
PF: predicated region fallthrough
CT: control target
= control target key end

     0   :  { %vm72_vm0 = vcmask 392192   ;;  %v505_v2 = vmov 0   ;;  %s681_s0 = inlined_call_operand.vmem [shape: f32[128,48], index: 0, kind: input, shape index: {}]   ;;  %s682_s1 = inlined_call_operand.vmem [shape: f32[32,48], index: 1, kind: input, shape index: {}]   ;;  %s683_s2 = inlined_call_operand.vmem [shape: f32[32,1], index: 2, kind: input, shape index: {}]   ;;  %s684_s3 = inlined_call_operand.vmem [shape: f32[16,32], index: 3, kind: input, shape index: {}]   ;;  %s685_s4 = inlined_call_operand.vmem [shape: f32[16,1], index: 4, kind: input, shape index: {}]   ;;  %s686_s5 = inlined_call_operand.vmem [shape: f32[16,1], index: 5, kind: input, shape index: {}]   ;;  %s687_s6 = inlined_call_operand.<no memory space> [shape: f32[1], index: 6, kind: input, shape index: {}]   ;;  %s688_s7 = inlined_call_operand.hbm [shape: f32[1,128], index: 7, kind: output, shape index: {}]  }
   0x1   :  { %v43_v0 = vld [vmem:[%s681_s0 + $0x78] sm:$0xff]  ;;  %v42_v1 = vld [vmem:[%s681_s0 + $0x70] sm:$0xff]  ;;  %477 = vset.pattern.permute.xlu0 %v505_v2  ;;  %478 = vset.pattern.permute.xlu1 %v505_v2  ;;  %v41_v3 = vld [vmem:[%s681_s0 + $0x68] sm:$0xff] }
   0x2   :  { %426 = vmatprep.subr.msk.mxu0 %vm72_vm0, %v43_v0  ;;  %v44_v4 = vld [vmem:[%s682_s1] sm:$0xff]  ;;  %v51_v5 = vld [vmem:[%s683_s2 + $0x18] sm:$0xff]  ;;  %v49_v6 = vld [vmem:[%s683_s2 + $0x8] sm:$0xff] }
   0x3   :  { %427 = vmatpush3.xpose.msk.msra.mxu0 %vm72_vm0, %v43_v0  ;;  %458 = vmatprep.mubr.msk.f32.mxu0 %vm72_vm0, %v44_v4  ;;  %v40_v7 = vld [vmem:[%s681_s0 + $0x60] sm:$0xff]  ;;  %v50_v8 = vld [vmem:[%s683_s2 + $0x10] sm:$0xff] }
   0x4   :  { %428 = vmatprep.subr.msk.mxu0 %vm72_vm0, %v42_v1  ;;  %69 = vperm.xlu0 %477, %v51_v5   ;;  %v48_v9 = vld [vmem:[%s683_s2] sm:$0xff] }
   0x5   :  { %59 = vperm.xlu1 %478, %v49_v6  }
   0x7   :  { %429 = vmatpush3.xpose.msk.msra.mxu0 %vm72_vm0, %v42_v1 }
   0x8   :  { %430 = vmatprep.subr.msk.mxu0 %vm72_vm0, %v41_v3 }
   0x9   :  { %13 = vsyncpa [#allocation4], 0  ;;  %64 = vperm.xlu0 %477, %v50_v8   ;;  %v39_v10 = vld [vmem:[%s681_s0 + $0x58] sm:$0xff]  ;;  %v232_v11 = vld [vmem:[%s685_s4] sm:$0xff]  ;;  %54 = vperm.xlu1 %478, %v48_v9   ;;  %vm244_vm1 = vcmask 261120   ;;  %s506_s9 = smov [#allocation3]  }
   0xa   :  { %v233_v12 = vld [vmem:[%s685_s4 + $0x8] sm:$0xff]  ;;  %v38_v13 = vld [vmem:[%s681_s0 + $0x50] sm:$0xff]  ;;  %v332_v14 = vld [vmem:[%s686_s5] sm:$0xff] }
   0xb   :  { %431 = vmatpush3.xpose.msk.msra.mxu0 %vm72_vm0, %v41_v3  ;;  %v333_v15 = vld [vmem:[%s686_s5 + $0x8] sm:$0xff]  ;;  %v36_v17 = vld [vmem:[%s681_s0 + $0x40] sm:$0xff]  ;;  %v35_v18 = vld [vmem:[%s681_s0 + $0x38] sm:$0xff]  ;;  %s369_s5 = sshll.u32 %s506_s9, 4  ;;  %s370_s5 = int_to_ptr.vmem [resolvable:$true] %s369_s5 }
   0xc   :  { %432 = vmatprep.subr.msk.mxu0 %vm72_vm0, %v40_v7  ;;  %v37_v16 = vld [vmem:[%s681_s0 + $0x48] sm:$0xff]  ;;  %v34_v19 = vld [vmem:[%s681_s0 + $0x30] sm:$0xff]  ;;  %v32_v21 = vld [vmem:[%s681_s0 + $0x20] sm:$0xff]  ;;  %s483_s10 = scalar_lea.vmem %s370_s5, 16  ;;  %s487_s11 = scalar_lea.vmem %s370_s5, 32 }
   0xd   :  { %236 = vperm.xlu0 %477, %v232_v11   ;;  %241 = vperm.xlu1 %478, %v233_v12   ;;  %v33_v20 = vld [vmem:[%s681_s0 + $0x28] sm:$0xff]  ;;  %v31_v22 = vld [vmem:[%s681_s0 + $0x18] sm:$0xff]  ;;  %v30_v23 = vld [vmem:[%s681_s0 + $0x10] sm:$0xff]  ;;  %p484_p0 = scmp.ne.s32.totalorder %s370_s5, %s483_s10  ;;  %p488_p1 = scmp.lt.s32.totalorder %s370_s5, %s370_s5 }
   0xe   :  { %v29_v24 = vld [vmem:[%s681_s0 + $0x8] sm:$0xff]  ;;  %v28_v25 = vld [vmem:[%s681_s0] sm:$0xff]  ;;  %v46_v27 = vld [vmem:[%s682_s1 + $0x10] sm:$0xff]  ;;  %p489_p2 = scmp.lt.s32.totalorder %s487_s11, %s483_s10 }
   0xf   :  { %433 = vmatpush3.xpose.msk.msra.mxu0 %vm72_vm0, %v40_v7  ;;  %v45_v26 = vld [vmem:[%s682_s1 + $0x8] sm:$0xff]  ;;  %v47_v28 = vld [vmem:[%s682_s1 + $0x18] sm:$0xff]  ;;  %v230_v29 = vld [vmem:[%s684_s3] sm:$0xff]  ;;  %v354_v7 = vstv %s687_s6 }
  0x10   :  { %434 = vmatprep.subr.msk.mxu0 %vm72_vm0, %v39_v10  ;;  %472 = vmatprep.mubr.msk.f32.mxu1 %vm244_vm1, %v230_v29  ;;  %v231_v50 = vld [vmem:[%s684_s3 + $0x8] sm:$0xff]  ;;  %p490_p3 = por %p489_p2, %p488_p1 }
  0x11   :  { %336 = vperm.xlu0 %477, %v332_v14   ;;  %341 = vperm.xlu1 %478, %v333_v15  }
  0x12   :  { %p491_p4 = pnand %p490_p3, %p484_p0 }
  0x13   :  { %435 = vmatpush3.xpose.msk.msra.mxu0 %vm72_vm0, %v39_v10 }
  0x14   :  { %436 = vmatprep.subr.msk.mxu0 %vm72_vm0, %v38_v13 }
  0x17   :  { %437 = vmatpush3.xpose.msk.msra.mxu0 %vm72_vm0, %v38_v13 }
  0x18   :  { %438 = vmatprep.subr.msk.mxu0 %vm72_vm0, %v37_v16 }
  0x1b   :  { %439 = vmatpush3.xpose.msk.msra.mxu0 %vm72_vm0, %v37_v16 }
  0x1c   :  { %440 = vmatprep.subr.msk.mxu0 %vm72_vm0, %v36_v17 }
  0x1f   :  { %441 = vmatpush3.xpose.msk.msra.mxu0 %vm72_vm0, %v36_v17 }
  0x20   :  { %442 = vmatprep.subr.msk.mxu0 %vm72_vm0, %v35_v18 }
  0x23   :  { %443 = vmatpush3.xpose.msk.msra.mxu0 %vm72_vm0, %v35_v18 }
  0x24   :  { %444 = vmatprep.subr.msk.mxu0 %vm72_vm0, %v34_v19 }
  0x27   :  { %445 = vmatpush3.xpose.msk.msra.mxu0 %vm72_vm0, %v34_v19 }
  0x28   :  { %446 = vmatprep.subr.msk.mxu0 %vm72_vm0, %v33_v20 }
  0x2b   :  { %447 = vmatpush3.xpose.msk.msra.mxu0 %vm72_vm0, %v33_v20 }
  0x2c   :  { %448 = vmatprep.subr.msk.mxu0 %vm72_vm0, %v32_v21 }
  0x2f   :  { %449 = vmatpush3.xpose.msk.msra.mxu0 %vm72_vm0, %v32_v21 }
  0x30   :  { %450 = vmatprep.subr.msk.mxu0 %vm72_vm0, %v31_v22 }
  0x33   :  { %451 = vmatpush3.xpose.msk.msra.mxu0 %vm72_vm0, %v31_v22 }
  0x34   :  { %452 = vmatprep.subr.msk.mxu0 %vm72_vm0, %v30_v23 }
  0x37   :  { %453 = vmatpush3.xpose.msk.msra.mxu0 %vm72_vm0, %v30_v23 }
  0x38   :  { %454 = vmatprep.subr.msk.mxu0 %vm72_vm0, %v29_v24 }
  0x3b   :  { %455 = vmatpush3.xpose.msk.msra.mxu0 %vm72_vm0, %v29_v24 }
  0x3c   :  { %456 = vmatprep.subr.msk.mxu0 %vm72_vm0, %v28_v25 }
  0x3f   :  { %457 = vmatpush3.xpose.msk.msra.mxu0 %vm72_vm0, %v28_v25 }
  0x42   :  { %459 = vmatmul.mubr.msk.f32.vlgmr.msra.gmra.mxu0 %vm72_vm0, %v45_v26 }
  0x43   :  { %461 = vmatprep.mubr.msk.f32.mxu0 %vm72_vm0, %v46_v27 }
  0x46   :  { %462 = vmatmul.mubr.msk.f32.gmra.mxu0 %vm72_vm0, %v47_v28 }
  0x7f   :  { %v70_v30 = vpop.permute.xlu0 %69 }
  0x80   :  { %v60_v31 = vpop.permute.xlu1 %59 }
  0x84   :  { %v65_v35 = vpop.permute.xlu0 %64  ;;  %v55_v38 = vpop.permute.xlu1 %54 }
  0x88   :  { %v242_v51 = vpop.permute.xlu1 %241  ;;  %v237_v53 = vpop.permute.xlu0 %236 }
  0x8c   :  { %v337_v60 = vpop.permute.xlu0 %336  ;;  %v342_v61 = vpop.permute.xlu1 %341 }
 0x102   :  { %v460_v32 = vpop.f32.mrf.mxu0 }
 0x103   :  { %v205_v36 = vadd.f32 %v460_v32, %v60_v31 }
 0x104   :  { %v199_v33 = vpop.f32.mrf.mxu0 }
 0x105   :  { %v200_v40 = vadd.f32 %v199_v33, %v55_v38  ;;  %v223_v43 = vmul.f32 0.2, %v205_v36  ;;  %vm219_vm4 = vcmp.gt.f32.partialorder %v205_v36, 0.0 }
 0x106   :  { %v463_v34 = vpop.f32.mrf.mxu0 }
 0x107   :  { %v215_v37 = vadd.f32 %v463_v34, %v70_v30  ;;  %v222_v46 = vmul.f32 0.2, %v200_v40  ;;  %vm218_vm5 = vcmp.gt.f32.partialorder %v200_v40, 0.0  ;;  %v227_v48 = vsel %vm219_vm4, %v205_v36, %v223_v43 }
 0x108   :  { %v209_v39 = vpop.f32.mrf.mxu0 }
 0x109   :  { %v210_v41 = vadd.f32 %v209_v39, %v65_v35  ;;  %vm221_vm2 = vcmp.gt.f32.partialorder %v215_v37, 0.0  ;;  %v225_v42 = vmul.f32 0.2, %v215_v37  ;;  %v226_v49 = vsel %vm218_vm5, %v200_v40, %v222_v46 }
 0x10b   :  { %v224_v44 = vmul.f32 0.2, %v210_v41  ;;  %v229_v45 = vsel %vm221_vm2, %v215_v37, %v225_v42  ;;  %vm220_vm3 = vcmp.gt.f32.partialorder %v210_v41, 0.0 }
 0x10c   :  { %464 = vmatprep.subr.mxu1 %v229_v45 }
 0x10d   :  { %465 = vmatpush3.msra.mxu1 %v229_v45  ;;  %v228_v47 = vsel %vm220_vm3, %v210_v41, %v224_v44 }
 0x10e   :  { %466 = vmatprep.subr.mxu1 %v228_v47 }
 0x10f   :  { %467 = vmatpush3.msra.mxu1 %v228_v47 }
 0x110   :  { %468 = vmatprep.subr.mxu1 %v227_v48 }
 0x111   :  { %469 = vmatpush3.msra.mxu1 %v227_v48 }
 0x112   :  { %470 = vmatprep.subr.mxu1 %v226_v49 }
 0x113   :  { %471 = vmatpush3.msra.mxu1 %v226_v49 }
 0x114   :  { %473 = vmatmul.mubr.msk.f32.vlgmr.msra.gmra.mxu1 %vm244_vm1, %v231_v50 }
 0x1d4   :  { %v474_v52 = vpop.f32.mrf.mxu1 }
 0x1d5   :  { %v323_v54 = vadd.f32 %v474_v52, %v242_v51 }
 0x1d6   :  { %v317_v55 = vpop.f32.mrf.mxu1 }
 0x1d7   :  { %vm327_vm6 = vcmp.gt.f32.partialorder %v323_v54, 0.0  ;;  %v329_v56 = vmul.f32 0.2, %v323_v54  ;;  %v318_v57 = vadd.f32 %v317_v55, %v237_v53 }
 0x1d9   :  { %v331_v58 = vsel %vm327_vm6, %v323_v54, %v329_v56  ;;  %vm326_vm7 = vcmp.gt.f32.partialorder %v318_v57, 0.0  ;;  %v328_v59 = vmul.f32 0.2, %v318_v57 }
 0x1da   :  { %v345_v63 = vmul.f32 %v342_v61, %v331_v58 }
 0x1db   :  { %v330_v62 = vsel %vm326_vm7, %v318_v57, %v328_v59 }
 0x1dc   :  { %v344_v0 = vmul.f32 %v337_v60, %v330_v62 }
 0x1de   :  { %v346_v1 = vadd.f32 %v345_v63, %v344_v0 }
 0x1e0   :  { %v347_v2 = vrot.slane %v346_v1, 4 }
 0x1e2   :  { %v348_v3 = vadd.f32 %v347_v2, %v346_v1 }
 0x1e4   :  { %v349_v4 = vrot.slane %v348_v3, 2 }
 0x1e6   :  { %v350_v5 = vadd.f32 %v349_v4, %v348_v3 }
 0x1e8   :  { %v351_v6 = vrot.slane %v350_v5, 1 }
 0x1ea   :  { %v352_v8 = vadd.f32 %v351_v6, %v350_v5 }
 0x1ec   :  { %v355_v9 = vadd.f32 %v354_v7, %v352_v8 }
 0x1ee   :  { %v399_v10 = vmul.f32 -1.442695, %v355_v9 }
 0x1f0   :  { %479 = vpow2.f32 %v399_v10 }
 0x1fd   :  { %v480_v11 = vpop.eup %479 }
 0x1fe   :  { %v359_v12 = vadd.f32 1.0, %v480_v11 }
 0x200   :  { %481 = vrcp.f32 %v359_v12 }
 0x20d   :  { %v482_v13 = vpop.eup %481 }
 0x20e   :  { %362 = vst [vmem:[#allocation3] sm:$0x1] %v482_v13 }
 0x20f   :  { %494 = shalt.err (!%p491_p4)
}
 0x210   :  { %372 = dma.vmem_to_hbm [thread:$0]  %s370_s5, 16, %s688_s7, [#allocation4]  }
 0x211   :  { %503 = dma.done.wait [#allocation4], 16  }
 0x212   :  { %504 = vsyncadd [#allocation4], 4294967280 }
 0x213   :  { %376 = vsyncpa [#allocation4], 1 }

</bundles_post_ra>
